<compile_context>
chip_gen: v6e
topology: v6e:2x2x1
jax: 0.10.0
libtpu: 0.0.40
codegen_flags: <defaults>
</compile_context>

<pallas_src>
import functools

import jax
import jax.numpy as jnp
from jax.experimental import pallas as pl
from jax.experimental.pallas import tpu as pltpu
import numpy as np


def _rup(x, m):
    return ((x + m - 1) // m) * m


# ----------------------------------------------------------------------------- kernel
def _mha_image_embed_kernel(img_ref, q_ref, w_ref, out_ref, *,
                            num_heads, seq_len,
                            off_wq, off_wo, off_seg, off_segt, off_shift, off_bias):
    BL, Di = img_ref.shape          # (B*L, img_dim)
    B, E = q_ref.shape              # (B, question_dim)
    L = seq_len
    NH = num_heads
    W = 2 * E                       # packed lane width (k|v, and the output slab)

    # ---- packed parameter slab: 8-aligned static row slices ----
    w_kv   = w_ref[0:Di, :]                       # (Di, 2E)  [Wk^T | Wv^T]
    w_q    = w_ref[off_wq:off_wq + E, :]          # (E,  2E)  [scale*Wq^T | 0]
    w_o    = w_ref[off_wo:off_wo + W, :]          # (2E, 2E)  rows [E,2E) = Wo^T into lanes [0,E)
    seg    = w_ref[off_seg:off_seg + W, 0:NH]     # (2E, NH)  k-lane -> head indicator
    segt   = w_ref[off_segt:off_segt + NH, :]     # (NH, 2E)  head -> v-lane expansion
    shiftm = w_ref[off_shift:off_shift + L, :]    # (L,  2E)  wavg -> output lanes [E, E+L)
    bias   = w_ref[off_bias:off_bias + 8, :]      # rows: [s*bq|0], [bk|bv], [bo|0], pad
    b_q  = bias[0:1, :]
    b_kv = bias[1:2, :]
    b_o  = bias[2:3, :]

    # ---- projections: two dense MXU matmuls (scale already folded into w_q / b_q) ----
    q_pad = jnp.dot(q_ref[...], w_q, preferred_element_type=jnp.float32) + b_q   # (B, 2E)  [q | 0]
    kv = jnp.dot(img_ref[...], w_kv, preferred_element_type=jnp.float32) + b_kv  # (B*L, 2E) [k | v]

    # ---- attention scores for all heads at once ----
    q_bcast = jnp.broadcast_to(q_pad[:, None, :], (B, L, W)).reshape(BL, W)
    prod = q_bcast * kv                                                   # lanes >= E are zero
    scores = jnp.dot(prod, seg, preferred_element_type=jnp.float32)      # (B*L, NH)

    # ---- one softmax pass over L (per batch, per head) ----
    s3 = scores.reshape(B, L, NH)
    m = jnp.max(s3, axis=1, keepdims=True)
    e3 = jnp.exp(s3 - m)
    inv = pl.reciprocal(jnp.sum(e3, axis=1, keepdims=True), approx=False)
    p3 = e3 * inv                                                        # (B, L, NH)

    # ---- context for all heads: MXU head expansion + one sublane reduce over L ----
    p_flat = p3.reshape(BL, NH)
    pe = jnp.dot(p_flat, segt, preferred_element_type=jnp.float32)       # (B*L, 2E), lanes < E zero
    ctx = (pe * kv).reshape(B, L, W).sum(axis=1)                         # (B, 2E), ctx in lanes [E, 2E)

    # ---- head-averaged attention weights placed into output lanes [E, E+L) via MXU ----
    wavg = jnp.sum(p3, axis=-1) * (1.0 / NH)                             # (B, L)
    w_place = jnp.dot(wavg, shiftm, preferred_element_type=jnp.float32)  # (B, 2E)

    # ---- output projection + single lane-dense packed store ----
    out_ref[...] = (jnp.dot(ctx, w_o, preferred_element_type=jnp.float32)
                    + b_o + w_place)


# ----------------------------------------------------------------------------- wrapper
class MultiHeadImageFeatureEmbeddingPallas:
    """Mirrors MultiHeadImageFeatureEmbedding(img_dim, question_dim, num_heads=...)."""

    def __init__(self, img_dim, question_dim, num_heads=4, seed=0):
        assert question_dim % num_heads == 0
        self.Di, self.E, self.NH = img_dim, question_dim, num_heads
        self.HD = question_dim // num_heads
        self.out_dim = question_dim
        self.W = 2 * question_dim
        assert self.W % 128 == 0, "packed lane width (2*question_dim) must be a multiple of 128"

        k = jax.random.split(jax.random.PRNGKey(seed), 8)
        s = 0.1
        # PyTorch nn.MultiheadAttention params (kdim=vdim=img_dim != embed_dim path):
        #   q_proj_weight (E, E), k_proj_weight (E, Di), v_proj_weight (E, Di),
        #   in_proj_bias (3E,), out_proj.weight (E, E), out_proj.bias (E,)
        self.wq = s * jax.random.normal(k[0], (self.E, self.E), jnp.float32)
        self.wk = s * jax.random.normal(k[1], (self.E, self.Di), jnp.float32)
        self.wv = s * jax.random.normal(k[2], (self.E, self.Di), jnp.float32)
        self.bq = s * jax.random.normal(k[3], (self.E,), jnp.float32)
        self.bk = s * jax.random.normal(k[4], (self.E,), jnp.float32)
        self.bv = s * jax.random.normal(k[5], (self.E,), jnp.float32)
        self.wo = s * jax.random.normal(k[6], (self.E, self.E), jnp.float32)
        self.bo = s * jax.random.normal(k[7], (self.E,), jnp.float32)

        self._slab_cache = {}   # keyed by L (the shift block / layout depends on seq length)

    # one pre-packed, row-sliceable parameter slab (built host-side, cached per L)
    def _packed_slab(self, L):
        if L in self._slab_cache:
            return self._slab_cache[L]
        Di, E, NH, HD, W = self.Di, self.E, self.NH, self.HD, self.W
        assert E + L <= W, "attention weights must fit inside the packed output lanes"

        off_wq = _rup(Di, 8)
        off_wo = _rup(off_wq + E, 8)
        off_seg = _rup(off_wo + W, 8)
        off_segt = _rup(off_seg + W, 8)
        off_shift = _rup(off_segt + NH, 8)
        off_bias = _rup(off_shift + L, 8)
        rows = off_bias + 8

        scale = float(HD) ** -0.5
        slab = np.zeros((rows, W), np.float32)
        # fused K/V projection: [Wk^T | Wv^T]
        slab[0:Di, 0:E] = np.asarray(self.wk).T
        slab[0:Di, E:W] = np.asarray(self.wv).T
        # Q projection with 1/sqrt(head_dim) folded in, lanes [0, E)
        slab[off_wq:off_wq + E, 0:E] = scale * np.asarray(self.wq).T
        # output projection: rows [E, 2E) map ctx lanes -> output lanes [0, E)
        slab[off_wo + E:off_wo + W, 0:E] = np.asarray(self.wo).T
        # head-segment matrix: k-lane e -> score column e // HD
        for h in range(NH):
            slab[off_seg + h * HD:off_seg + (h + 1) * HD, h] = 1.0
        # head-expansion matrix: prob of head h -> v-lanes [E + h*HD, E + (h+1)*HD)
        for h in range(NH):
            slab[off_segt + h, E + h * HD:E + (h + 1) * HD] = 1.0
        # shift matrix: wavg column l -> output lane E + l
        for l in range(L):
            slab[off_shift + l, E + l] = 1.0
        # biases (scale folded into b_q)
        slab[off_bias + 0, 0:E] = scale * np.asarray(self.bq)
        slab[off_bias + 1, 0:E] = np.asarray(self.bk)
        slab[off_bias + 1, E:W] = np.asarray(self.bv)
        slab[off_bias + 2, 0:E] = np.asarray(self.bo)

        offs = dict(off_wq=off_wq, off_wo=off_wo, off_seg=off_seg, off_segt=off_segt,
                    off_shift=off_shift, off_bias=off_bias)
        packed = (jnp.asarray(slab), offs)
        self._slab_cache[L] = packed
        return packed

    def __call__(self, image_feat_variable, question_embedding, image_dims=None, extra=None):
        # image_dims / extra accepted for signature parity but (as in PyTorch) unused.
        B, L, Di = image_feat_variable.shape
        assert Di == self.Di and question_embedding.shape == (B, self.E)
        slab, offs = self._packed_slab(L)

        kernel = functools.partial(_mha_image_embed_kernel,
                                   num_heads=self.NH, seq_len=L, **offs)
        vmem = pl.BlockSpec(memory_space=pltpu.MemorySpace.VMEM)
        fn = pl.pallas_call(
            kernel,
            out_shape=jax.ShapeDtypeStruct((B, self.W), jnp.float32),
            in_specs=[vmem, vmem, vmem],
            out_specs=vmem,
        )
        packed = fn(
            image_feat_variable.reshape(B * L, Di).astype(jnp.float32),
            question_embedding.astype(jnp.float32),
            slab,
        )
        out = packed[:, :self.E]                              # (B, E)
        weights = packed[:, self.E:self.E + L].reshape(B, 1, L)
        # PyTorch: output.transpose(0, 1).squeeze()  -> (B, E) for B > 1
        output = jnp.squeeze(out[:, None, :])
        return output, weights

    # pure-JAX reference (same math as nn.MultiheadAttention) for verification
    def reference(self, image_feat_variable, question_embedding):
        B, L, Di = image_feat_variable.shape
        E, NH, HD = self.E, self.NH, self.HD
        q = question_embedding @ self.wq.T + self.bq                    # (B, E)
        k = image_feat_variable @ self.wk.T + self.bk                   # (B, L, E)
        v = image_feat_variable @ self.wv.T + self.bv
        qh = q.reshape(B, NH, HD)
        kh = k.reshape(B, L, NH, HD)
        vh = v.reshape(B, L, NH, HD)
        scores = jnp.einsum('bhd,blhd->bhl', qh, kh) / np.sqrt(HD)
        p = jax.nn.softmax(scores, axis=-1)                             # (B, NH, L)
        ctx = jnp.einsum('bhl,blhd->bhd', p, vh).reshape(B, E)
        out = ctx @ self.wo.T + self.bo                                 # (B, E)
        weights = jnp.mean(p, axis=1)[:, None, :]                       # (B, 1, L)
        return out, weights


# ----------------------------------------------------------------------------- main
if __name__ == "__main__":
    B, L = 2, 16
    IMG_DIM, Q_DIM, NUM_HEADS = 128, 64, 4

    module = MultiHeadImageFeatureEmbeddingPallas(
        img_dim=IMG_DIM, question_dim=Q_DIM, num_heads=NUM_HEADS, seed=0)

    k1, k2 = jax.random.split(jax.random.PRNGKey(0))
    image_feats = jax.random.normal(k1, (B, L, IMG_DIM), jnp.float32)
    question_emb = jax.random.normal(k2, (B, Q_DIM), jnp.float32)
    image_dims = jnp.full((B, 1), L, jnp.int32)   # present in the API, unused by forward

    out, weights = module(image_feats, question_emb, image_dims)
    out = jax.block_until_ready(out)
    weights = jax.block_until_ready(weights)

    ref_out, ref_w = module.reference(image_feats, question_emb)
    np.testing.assert_allclose(np.asarray(out), np.asarray(ref_out), rtol=1e-4, atol=1e-4)
    np.testing.assert_allclose(np.asarray(weights), np.asarray(ref_w), rtol=1e-4, atol=1e-4)
    assert out.shape == (B, module.out_dim)
    assert weights.shape == (B, 1, L)

    print("KERNEL_OK")
</pallas_src>

<mosaic_0001>
module attributes {stable_mosaic.version = 11 : i64} {
  func.func @_mha_image_embed_kernel(%arg0: memref<32x128xf32, #tpu.memory_space<vmem>>, %arg1: memref<2x64xf32, #tpu.memory_space<vmem>>, %arg2: memref<480x128xf32, #tpu.memory_space<vmem>>, %arg3: memref<2x128xf32, #tpu.memory_space<vmem>>) attributes {dimension_semantics = [], scalar_prefetch = 0 : i64, scratch_operands = 0 : i64, tpu.core_type = #tpu.core_type<tc>} {
    %c0 = arith.constant 0 : index
    %c0_0 = arith.constant 0 : index
    %0 = vector.load %arg2[%c0, %c0_0] : memref<480x128xf32, #tpu.memory_space<vmem>>, vector<128x128xf32>
    %c128 = arith.constant 128 : index
    %c0_1 = arith.constant 0 : index
    %1 = vector.load %arg2[%c128, %c0_1] : memref<480x128xf32, #tpu.memory_space<vmem>>, vector<64x128xf32>
    %c192 = arith.constant 192 : index
    %c0_2 = arith.constant 0 : index
    %2 = vector.load %arg2[%c192, %c0_2] : memref<480x128xf32, #tpu.memory_space<vmem>>, vector<128x128xf32>
    %c320 = arith.constant 320 : index
    %c0_3 = arith.constant 0 : index
    %3 = vector.load %arg2[%c320, %c0_3] : memref<480x128xf32, #tpu.memory_space<vmem>>, vector<128x4xf32>
    %c448 = arith.constant 448 : index
    %c0_4 = arith.constant 0 : index
    %4 = vector.load %arg2[%c448, %c0_4] : memref<480x128xf32, #tpu.memory_space<vmem>>, vector<4x128xf32>
    %c456 = arith.constant 456 : index
    %c0_5 = arith.constant 0 : index
    %5 = vector.load %arg2[%c456, %c0_5] : memref<480x128xf32, #tpu.memory_space<vmem>>, vector<16x128xf32>
    %c472 = arith.constant 472 : index
    %c0_6 = arith.constant 0 : index
    %6 = vector.load %arg2[%c472, %c0_6] : memref<480x128xf32, #tpu.memory_space<vmem>>, vector<8x128xf32>
    %7 = vector.extract_strided_slice %6 {offsets = [0, 0], sizes = [1, 128], strides = [1, 1]} : vector<8x128xf32> to vector<1x128xf32>
    %8 = vector.extract_strided_slice %6 {offsets = [1, 0], sizes = [1, 128], strides = [1, 1]} : vector<8x128xf32> to vector<1x128xf32>
    %9 = vector.extract_strided_slice %6 {offsets = [2, 0], sizes = [1, 128], strides = [1, 1]} : vector<8x128xf32> to vector<1x128xf32>
    %c0_7 = arith.constant 0 : index
    %c0_8 = arith.constant 0 : index
    %10 = vector.load %arg1[%c0_7, %c0_8] : memref<2x64xf32, #tpu.memory_space<vmem>>, vector<2x64xf32>
    %cst = arith.constant dense<0.000000e+00> : vector<2x128xf32>
    %11 = tpu.matmul %10, %1, %cst {dimension_numbers = #tpu.dot_dimension_numbers<[1], [0], [0], [1], [0, 0, 1, 1], [], []>} : vector<2x64xf32>, vector<64x128xf32>, vector<2x128xf32> -> vector<2x128xf32>
    %12 = vector.broadcast %7 : vector<1x128xf32> to vector<2x128xf32>
    %13 = arith.addf %11, %12 : vector<2x128xf32>
    %c0_9 = arith.constant 0 : index
    %c0_10 = arith.constant 0 : index
    %14 = vector.load %arg0[%c0_9, %c0_10] : memref<32x128xf32, #tpu.memory_space<vmem>>, vector<32x128xf32>
    %cst_11 = arith.constant dense<0.000000e+00> : vector<32x128xf32>
    %15 = tpu.matmul %14, %0, %cst_11 {dimension_numbers = #tpu.dot_dimension_numbers<[1], [0], [0], [1], [0, 0, 1, 1], [], []>} : vector<32x128xf32>, vector<128x128xf32>, vector<32x128xf32> -> vector<32x128xf32>
    %16 = vector.broadcast %8 : vector<1x128xf32> to vector<32x128xf32>
    %17 = arith.addf %15, %16 : vector<32x128xf32>
    %18 = vector.shape_cast %13 : vector<2x128xf32> to vector<2x1x128xf32>
    %19 = vector.shape_cast %18 : vector<2x1x128xf32> to vector<2x1x128xf32>
    %20 = vector.broadcast %19 : vector<2x1x128xf32> to vector<2x16x128xf32>
    %21 = vector.shape_cast %20 : vector<2x16x128xf32> to vector<32x128xf32>
    %22 = arith.mulf %21, %17 : vector<32x128xf32>
    %cst_12 = arith.constant dense<0.000000e+00> : vector<32x4xf32>
    %23 = tpu.matmul %22, %3, %cst_12 {dimension_numbers = #tpu.dot_dimension_numbers<[1], [0], [0], [1], [0, 0, 1, 1], [], []>} : vector<32x128xf32>, vector<128x4xf32>, vector<32x4xf32> -> vector<32x4xf32>
    %24 = vector.shape_cast %23 : vector<32x4xf32> to vector<2x16x4xf32>
    %cst_13 = arith.constant dense<0xFF800000> : vector<2x4xf32>
    %25 = vector.multi_reduction <maximumf>, %24, %cst_13 [1] : vector<2x16x4xf32> to vector<2x4xf32>
    %26 = vector.shape_cast %25 : vector<2x4xf32> to vector<2x1x4xf32>
    %27 = vector.broadcast %26 : vector<2x1x4xf32> to vector<2x16x4xf32>
    %28 = arith.subf %24, %27 : vector<2x16x4xf32>
    %29 = math.exp %28 : vector<2x16x4xf32>
    %cst_14 = arith.constant dense<0.000000e+00> : vector<2x4xf32>
    %30 = vector.multi_reduction <add>, %29, %cst_14 [1] : vector<2x16x4xf32> to vector<2x4xf32>
    %31 = vector.shape_cast %30 : vector<2x4xf32> to vector<2x1x4xf32>
    %32 = tpu.reciprocal %31 : vector<2x1x4xf32> -> vector<2x1x4xf32>
    %33 = vector.broadcast %32 : vector<2x1x4xf32> to vector<2x16x4xf32>
    %34 = arith.mulf %29, %33 : vector<2x16x4xf32>
    %35 = vector.shape_cast %34 : vector<2x16x4xf32> to vector<32x4xf32>
    %cst_15 = arith.constant dense<0.000000e+00> : vector<32x128xf32>
    %36 = tpu.matmul %35, %4, %cst_15 {dimension_numbers = #tpu.dot_dimension_numbers<[1], [0], [0], [1], [0, 0, 1, 1], [], []>} : vector<32x4xf32>, vector<4x128xf32>, vector<32x128xf32> -> vector<32x128xf32>
    %37 = arith.mulf %36, %17 : vector<32x128xf32>
    %38 = vector.shape_cast %37 : vector<32x128xf32> to vector<2x16x128xf32>
    %cst_16 = arith.constant dense<0.000000e+00> : vector<2x128xf32>
    %39 = vector.multi_reduction <add>, %38, %cst_16 [1] : vector<2x16x128xf32> to vector<2x128xf32>
    %cst_17 = arith.constant dense<0.000000e+00> : vector<2x16xf32>
    %40 = vector.multi_reduction <add>, %34, %cst_17 [2] : vector<2x16x4xf32> to vector<2x16xf32>
    %cst_18 = arith.constant 2.500000e-01 : f32
    %41 = vector.broadcast %cst_18 : f32 to vector<2x16xf32>
    %42 = arith.mulf %40, %41 : vector<2x16xf32>
    %cst_19 = arith.constant dense<0.000000e+00> : vector<2x128xf32>
    %43 = tpu.matmul %42, %5, %cst_19 {dimension_numbers = #tpu.dot_dimension_numbers<[1], [0], [0], [1], [0, 0, 1, 1], [], []>} : vector<2x16xf32>, vector<16x128xf32>, vector<2x128xf32> -> vector<2x128xf32>
    %cst_20 = arith.constant dense<0.000000e+00> : vector<2x128xf32>
    %44 = tpu.matmul %39, %2, %cst_20 {dimension_numbers = #tpu.dot_dimension_numbers<[1], [0], [0], [1], [0, 0, 1, 1], [], []>} : vector<2x128xf32>, vector<128x128xf32>, vector<2x128xf32> -> vector<2x128xf32>
    %45 = vector.broadcast %9 : vector<1x128xf32> to vector<2x128xf32>
    %46 = arith.addf %44, %45 : vector<2x128xf32>
    %47 = arith.addf %46, %43 : vector<2x128xf32>
    %c0_21 = arith.constant 0 : index
    %c0_22 = arith.constant 0 : index
    %48 = vector.load %arg3[%c0_21, %c0_22] : memref<2x128xf32, #tpu.memory_space<vmem>>, vector<2x128xf32>
    tpu.vector_store %arg3[%c0_21, %c0_22], %47 {strides = array<i32>} : memref<2x128xf32, #tpu.memory_space<vmem>>, vector<2x128xf32>,
    return
  }
}

</mosaic_0001>

<bundles_post_ra>
// kernel: tpu_custom_call.1
= control target key start
LH: loop header
LB: loop body
LE: loop exit
PB: predicated region body
PF: predicated region fallthrough
CT: control target
= control target key end

     0   :  { %8 = vsyncpa [#allocation3], 0  ;;  %s1250_s0 = inlined_call_operand.hbm [shape: f32[32,128], index: 0, kind: input, shape index: {}]   ;;  %s1251_s1 = inlined_call_operand.hbm [shape: f32[2,64], index: 1, kind: input, shape index: {}]   ;;  %s1252_s2 = inlined_call_operand.hbm [shape: f32[480,128], index: 2, kind: input, shape index: {}]   ;;  %s1253_s3 = inlined_call_operand.hbm [shape: f32[2,128], index: 3, kind: output, shape index: {}]  }
   0x1   :  { %9 = vsyncpa [#allocation6], 0 }
   0x2   :  { %10 = vsyncpa [#allocation4], 0  ;;  %s1128_s12 = smov [#allocation5]   ;;  %s1129_s14 = smov [#allocation2]  }
   0x3   :  { %s29_s13 = sshll.u32 %s1128_s12, 4  ;;  %s16_s15 = sshll.u32 %s1129_s14, 4  ;;  %s30_s13 = int_to_ptr.vmem [resolvable:$true] %s29_s13  ;;  %s17_s15 = int_to_ptr.vmem [resolvable:$true] %s16_s15 }
   0x4   :  { %s1050_s16 = scalar_lea.vmem %s30_s13, 32  ;;  %p1055_p1 = scmp.lt.s32.totalorder %s30_s13, %s30_s13 }
   0x5   :  { %p1051_p0 = scmp.ne.s32.totalorder %s30_s13, %s1050_s16  ;;  %p1056_p2 = scmp.lt.s32.totalorder %s1050_s16, %s1050_s16 }
   0x7   :  { %p1057_p3 = por %p1056_p2, %p1055_p1 }
   0x9   :  { %p1058_p4 = pnand %p1057_p3, %p1051_p0 }
   0xb   :  { %1061 = shalt.err (!%p1058_p4)
}
   0xc   :  { %32 = dma.hbm_to_vmem [thread:$0]  %s1251_s1, 32, %s30_s13, [#allocation6]  }
   0xd   :  { %s1070_s19 = scalar_lea.vmem %s17_s15, 512  ;;  %p1075_p6 = scmp.lt.s32.totalorder %s17_s15, %s17_s15 }
   0xe   :  { %p1071_p5 = scmp.ne.s32.totalorder %s17_s15, %s1070_s19  ;;  %p1076_p7 = scmp.lt.s32.totalorder %s1070_s19, %s1070_s19 }
  0x10   :  { %p1077_p8 = por %p1076_p7, %p1075_p6 }
  0x12   :  { %p1078_p9 = pnand %p1077_p8, %p1071_p5 }
  0x14   :  { %1081 = shalt.err (!%p1078_p9)
}
  0x15   :  { %s1130_s20 = smov 128   ;;  %s1131_s21 = smov 8  }
  0x16   :  { %22 = dma.hbm_to_vmem [thread:$0]  %s1250_s0, 512, %s17_s15, [#allocation3], %s1130_s20, %s1130_s20, %s1131_s21  }
  0x17   :  { %s1132_s24 = smov [#allocation7]  }
  0x18   :  { %s38_s25 = sshll.u32 %s1132_s24, 4  ;;  %s39_s25 = int_to_ptr.vmem [resolvable:$true] %s38_s25 }
  0x19   :  { %s1090_s26 = scalar_lea.vmem %s39_s25, 7680  ;;  %p1095_p11 = scmp.lt.s32.totalorder %s39_s25, %s39_s25 }
  0x1a   :  { %p1091_p10 = scmp.ne.s32.totalorder %s39_s25, %s1090_s26  ;;  %p1096_p12 = scmp.lt.s32.totalorder %s1090_s26, %s1090_s26 }
  0x1c   :  { %p1097_p13 = por %p1096_p12, %p1095_p11 }
  0x1e   :  { %p1098_p0 = pnand %p1097_p13, %p1091_p10 }
  0x20   :  { %1101 = shalt.err (!%p1098_p0)
}
  0x21   :  { %44 = dma.hbm_to_vmem [thread:$0]  %s1252_s2, 7680, %s39_s25, [#allocation6], %s1130_s20, %s1130_s20, %s1131_s21  }
  0x22   :  { %1122 = dma.done.wait [#allocation3], 512  }
  0x23   :  { %1123 = vsyncadd [#allocation3], 4294966784 }
  0x24   :  { %1124 = dma.done.wait [#allocation6], 7712  }
  0x25   :  { %1125 = vsyncadd [#allocation6], 4294959584  ;;  %v1133_v0 = vmov 0.0   ;;  %vm1134_vm0 = vmmov 0   ;;  %v77_v1 = vld [vmem:[#allocation7 + $0xb8] sm:$0xff]  ;;  %v76_v2 = vld [vmem:[#allocation7 + $0xb0] sm:$0xff]  ;;  %v115_v48 = vlaneseq }
  0x26   :  { %876 = vmatprep.subr.mxu1 %v1133_v0  ;;  %892 = vmatprep.mubr.msk.f32.mxu1 %vm1134_vm0, %v1133_v0  ;;  %v75_v3 = vld [vmem:[#allocation7 + $0xa8] sm:$0xff]  ;;  %v74_v4 = vld [vmem:[#allocation7 + $0xa0] sm:$0xff]  ;;  %v73_v5 = vld [vmem:[#allocation7 + $0x98] sm:$0xff]  ;;  %vm119_vm1 = vcmask 523264   ;;  %v1135_v51 = vmov 1966171168  }
  0x27   :  { %877 = vmatpush3.msra.mxu1 %v77_v1  ;;  %v72_v6 = vld [vmem:[#allocation7 + $0x90] sm:$0xff]  ;;  %v71_v7 = vld [vmem:[#allocation7 + $0x88] sm:$0xff]  ;;  %v70_v8 = vld [vmem:[#allocation7 + $0x80] sm:$0xff]  ;;  %v1178_v49 = vshrl.u32 %v115_v48, 7  ;;  %v288_v52 = vunpack.c.l.s4 %v1135_v51  ;;  %vm475_vm2 = vcmask 1043456   ;;  %vm408_vm3 = vcmask 31744  }
  0x28   :  { %878 = vmatprep.subr.mxu1 %v1133_v0  ;;  %v114_v9 = vld [vmem:[#allocation5] sm:$0x3]  ;;  %v68_v12 = vld [vmem:[#allocation7 + $0x70] sm:$0xff]  ;;  %v67_v13 = vld [vmem:[#allocation7 + $0x68] sm:$0xff]  ;;  %vm613_vm4 = vcmask 130112   ;;  %vm624_vm5 = vcmask 1041409  }
  0x29   :  { %879 = vmatpush3.msra.mxu1 %v76_v2  ;;  %v69_v10 = vld [vmem:[#allocation7 + $0x78] sm:$0xff]  ;;  %v66_v14 = vld [vmem:[#allocation7 + $0x60] sm:$0xff]  ;;  %v64_v16 = vld [vmem:[#allocation7 + $0x50] sm:$0xff]  ;;  %v117_v50 = vsub.s32 0, %v1178_v49  ;;  %v289_v55 = vunpack.c.0.s8 %v288_v52  ;;  %v199_v58 = vsub.s32 1, %v1178_v49  ;;  %vm626_vm6 = vcmask 130048  }
  0x2a   :  { %880 = vmatprep.subr.mxu1 %v1133_v0  ;;  %v193_v11 = vld [vmem:[#allocation2] sm:$0xff]  ;;  %v63_v17 = vld [vmem:[#allocation7 + $0x48] sm:$0xff]  ;;  %v60_v20 = vld [vmem:[#allocation7 + $0x30] sm:$0xff]  ;;  %s1136_s0 = smov [#allocation8]  }
  0x2b   :  { %881 = vmatpush3.msra.mxu1 %v75_v3  ;;  %v65_v15 = vld [vmem:[#allocation7 + $0x58] sm:$0xff]  ;;  %v62_v18 = vld [vmem:[#allocation7 + $0x40] sm:$0xff]  ;;  %v59_v21 = vld [vmem:[#allocation7 + $0x28] sm:$0xff]  ;;  %v292_v57 = vsub.s32 %v289_v55, %v1178_v49  ;;  %s785_s2 = sshll.u32 %s1136_s0, 4  ;;  %s786_s2 = int_to_ptr.vmem [resolvable:$true] %s785_s2 }
  0x2c   :  { %882 = vmatprep.subr.mxu1 %v1133_v0  ;;  %v61_v19 = vld [vmem:[#allocation7 + $0x38] sm:$0xff]  ;;  %v58_v22 = vld [vmem:[#allocation7 + $0x20] sm:$0xff]  ;;  %v56_v24 = vld [vmem:[#allocation7 + $0x10] sm:$0xff]  ;;  %s1102_s28 = scalar_lea.vmem %s786_s2, 32  ;;  %p1107_p2 = scmp.lt.s32.totalorder %s786_s2, %s786_s2 }
  0x2d   :  { %883 = vmatpush3.msra.mxu1 %v74_v4  ;;  %v57_v23 = vld [vmem:[#allocation7 + $0x18] sm:$0xff]  ;;  %v55_v25 = vld [vmem:[#allocation7 + $0x8] sm:$0xff]  ;;  %v54_v26 = vld [vmem:[#allocation7] sm:$0xff]  ;;  %p1103_p1 = scmp.ne.s32.totalorder %s786_s2, %s1102_s28  ;;  %p1108_p3 = scmp.lt.s32.totalorder %s1102_s28, %s1102_s28 }
  0x2e   :  { %884 = vmatprep.subr.mxu1 %v1133_v0  ;;  %v194_v27 = vld [vmem:[#allocation2 + $0x8] sm:$0xff]  ;;  %v195_v28 = vld [vmem:[#allocation2 + $0x10] sm:$0xff]  ;;  %v196_v29 = vld [vmem:[#allocation2 + $0x18] sm:$0xff] }
  0x2f   :  { %885 = vmatpush3.msra.mxu1 %v73_v5  ;;  %v109_v30 = vld [vmem:[#allocation7 + $0x1b8] sm:$0xff]  ;;  %v108_v31 = vld [vmem:[#allocation7 + $0x1b0] sm:$0xff]  ;;  %v107_v32 = vld [vmem:[#allocation7 + $0x1a8] sm:$0xff]  ;;  %p1109_p4 = por %p1108_p3, %p1107_p2 }
  0x30   :  { %886 = vmatprep.subr.mxu1 %v1133_v0  ;;  %933 = vmatprep.subr.mxu0 %v109_v30  ;;  %v106_v33 = vld [vmem:[#allocation7 + $0x1a0] sm:$0xff]  ;;  %v105_v34 = vld [vmem:[#allocation7 + $0x198] sm:$0xff]  ;;  %v104_v35 = vld [vmem:[#allocation7 + $0x190] sm:$0xff] }
  0x31   :  { %887 = vmatpush3.msra.mxu1 %v72_v6  ;;  %934 = vmatpush3.msra.mxu0 %v109_v30  ;;  %v103_v36 = vld [vmem:[#allocation7 + $0x188] sm:$0xff]  ;;  %v102_v37 = vld [vmem:[#allocation7 + $0x180] sm:$0xff]  ;;  %v101_v38 = vld [vmem:[#allocation7 + $0x178] sm:$0xff]  ;;  %p1110_p5 = pnand %p1109_p4, %p1103_p1 }
  0x32   :  { %888 = vmatprep.subr.mxu1 %v1133_v0  ;;  %935 = vmatprep.subr.mxu0 %v108_v31  ;;  %v100_v39 = vld [vmem:[#allocation7 + $0x170] sm:$0xff]  ;;  %v99_v40 = vld [vmem:[#allocation7 + $0x168] sm:$0xff]  ;;  %v98_v41 = vld [vmem:[#allocation7 + $0x160] sm:$0xff] }
  0x33   :  { %889 = vmatpush3.msra.mxu1 %v71_v7  ;;  %936 = vmatpush3.msra.mxu0 %v108_v31  ;;  %v97_v42 = vld [vmem:[#allocation7 + $0x158] sm:$0xff]  ;;  %v96_v43 = vld [vmem:[#allocation7 + $0x150] sm:$0xff]  ;;  %v95_v44 = vld [vmem:[#allocation7 + $0x148] sm:$0xff] }
  0x34   :  { %890 = vmatprep.subr.mxu1 %v1133_v0  ;;  %937 = vmatprep.subr.mxu0 %v107_v32  ;;  %v94_v45 = vld [vmem:[#allocation7 + $0x140] sm:$0xff]  ;;  %v1181_v53 = vld [vmem:[#allocation7 + $0x1d8] sm:$0xff] }
  0x35   :  { %891 = vmatpush3.msra.mxu1 %v70_v8  ;;  %938 = vmatpush3.msra.mxu0 %v107_v32  ;;  %v118_v54 = vrot.slane %v1181_v53, %v117_v50  ;;  %v200_v60 = vrot.slane %v1181_v53, %v199_v58 }
  0x36   :  { %893 = vmatmul.mubr.msk.f32.vlgmr.msra.gmra.mxu1 %vm119_vm1, %v114_v9  ;;  %895 = vmatprep.subr.mxu1 %v69_v10 }
  0x37   :  { %896 = vmatpush3.msra.mxu1 %v69_v10  ;;  %927 = vmatprep.mubr.f32.mxu1 %v193_v11 }
  0x38   :  { %897 = vmatprep.subr.mxu1 %v68_v12  ;;  %939 = vmatprep.subr.mxu0 %v106_v33 }
  0x39   :  { %898 = vmatpush3.msra.mxu1 %v68_v12  ;;  %940 = vmatpush3.msra.mxu0 %v106_v33 }
  0x3a   :  { %899 = vmatprep.subr.mxu1 %v67_v13  ;;  %941 = vmatprep.subr.mxu0 %v105_v34 }
  0x3b   :  { %900 = vmatpush3.msra.mxu1 %v67_v13  ;;  %942 = vmatpush3.msra.mxu0 %v105_v34 }
  0x3c   :  { %901 = vmatprep.subr.mxu1 %v66_v14  ;;  %943 = vmatprep.subr.mxu0 %v104_v35 }
  0x3d   :  { %902 = vmatpush3.msra.mxu1 %v66_v14  ;;  %944 = vmatpush3.msra.mxu0 %v104_v35 }
  0x3e   :  { %903 = vmatprep.subr.mxu1 %v65_v15  ;;  %945 = vmatprep.subr.mxu0 %v103_v36 }
  0x3f   :  { %904 = vmatpush3.msra.mxu1 %v65_v15  ;;  %946 = vmatpush3.msra.mxu0 %v103_v36  ;;  %v110_v15 = vld [vmem:[#allocation7 + $0x1c0] sm:$0xf] }
  0x40   :  { %905 = vmatprep.subr.mxu1 %v64_v16  ;;  %947 = vmatprep.subr.mxu0 %v102_v37 }
  0x41   :  { %906 = vmatpush3.msra.mxu1 %v64_v16  ;;  %948 = vmatpush3.msra.mxu0 %v102_v37 }
  0x42   :  { %907 = vmatprep.subr.mxu1 %v63_v17  ;;  %949 = vmatprep.subr.mxu0 %v101_v38 }
  0x43   :  { %908 = vmatpush3.msra.mxu1 %v63_v17  ;;  %950 = vmatpush3.msra.mxu0 %v101_v38 }
  0x44   :  { %909 = vmatprep.subr.mxu1 %v62_v18  ;;  %951 = vmatprep.subr.mxu0 %v100_v39 }
  0x45   :  { %910 = vmatpush3.msra.mxu1 %v62_v18  ;;  %952 = vmatpush3.msra.mxu0 %v100_v39 }
  0x46   :  { %911 = vmatprep.subr.mxu1 %v61_v19  ;;  %953 = vmatprep.subr.mxu0 %v99_v40 }
  0x47   :  { %912 = vmatpush3.msra.mxu1 %v61_v19  ;;  %954 = vmatpush3.msra.mxu0 %v99_v40 }
  0x48   :  { %913 = vmatprep.subr.mxu1 %v60_v20  ;;  %955 = vmatprep.subr.mxu0 %v98_v41 }
  0x49   :  { %914 = vmatpush3.msra.mxu1 %v60_v20  ;;  %956 = vmatpush3.msra.mxu0 %v98_v41 }
  0x4a   :  { %915 = vmatprep.subr.mxu1 %v59_v21  ;;  %957 = vmatprep.subr.mxu0 %v97_v42 }
  0x4b   :  { %916 = vmatpush3.msra.mxu1 %v59_v21  ;;  %958 = vmatpush3.msra.mxu0 %v97_v42 }
  0x4c   :  { %917 = vmatprep.subr.mxu1 %v58_v22  ;;  %959 = vmatprep.subr.mxu0 %v96_v43 }
  0x4d   :  { %918 = vmatpush3.msra.mxu1 %v58_v22  ;;  %960 = vmatpush3.msra.mxu0 %v96_v43 }
  0x4e   :  { %919 = vmatprep.subr.mxu1 %v57_v23  ;;  %961 = vmatprep.subr.mxu0 %v95_v44 }
  0x4f   :  { %920 = vmatpush3.msra.mxu1 %v57_v23  ;;  %962 = vmatpush3.msra.mxu0 %v95_v44 }
  0x50   :  { %921 = vmatprep.subr.mxu1 %v56_v24  ;;  %963 = vmatprep.subr.mxu0 %v94_v45 }
  0x51   :  { %922 = vmatpush3.msra.mxu1 %v56_v24  ;;  %964 = vmatpush3.msra.mxu0 %v94_v45 }
  0x52   :  { %923 = vmatprep.subr.mxu1 %v55_v25  ;;  %986 = vmatprep.subr.mxu0 %v1133_v0 }
  0x53   :  { %924 = vmatpush3.msra.mxu1 %v55_v25 }
  0x54   :  { %925 = vmatprep.subr.mxu1 %v54_v26 }
  0x55   :  { %926 = vmatpush3.msra.mxu1 %v54_v26 }
  0x56   :  { %928 = vmatmul.mubr.f32.vlgmr.msra.gmra.mxu1 %v194_v27  ;;  %971 = vmatprep.subr.msk.mxu1 %vm475_vm2, %v110_v15 }
  0x57   :  { %930 = vmatprep.mubr.f32.mxu1 %v195_v28  ;;  %972 = vmatpush3.msk.msra.mxu1 %vm475_vm2, %v110_v15 }
  0x58   :  { %979 = vmatprep.subr.mxu1 %v1133_v0 }
  0x5a   :  { %931 = vmatmul.mubr.f32.gmra.mxu1 %v196_v29 }
  0xf6   :  { %v189_v46 = vpop.f32.mrf.mxu1 }
  0xf7   :  { %v190_v56 = vadd.f32 %v189_v46, %v118_v54 }
  0xf8   :  { %v894_v47 = vpop.f32.mrf.mxu1 }
  0xf9   :  { %v293_v59 = vrot.slane %v190_v56, %v292_v57 }
  0xfb   :  { %v294_v61 = vcombine.high %v293_v59, %v293_v59  ;;  %v301_v62 = vrot.slane %v293_v59, %v292_v57 }
  0xfd   :  { %v308_v4 = vrot.slane %v294_v61, %v292_v57  ;;  %v312_v5 = vrot.slane %v301_v62, %v117_v50 }
  0xff   :  { %v316_v11 = vrot.slane %v308_v4, %v117_v50 }
 0x116   :  { %v929_v63 = vpop.f32.mrf.mxu1 }
 0x117   :  { %v1187_v1 = vadd.f32 %v929_v63, %v200_v60 }
 0x118   :  { %v267_v2 = vpop.f32.mrf.mxu1 }
 0x119   :  { %v1189_v3 = vadd.f32 %v267_v2, %v200_v60  ;;  %v320_v10 = vmul.f32 %v312_v5, %v1187_v1 }
 0x11a   :  { %v932_v6 = vpop.f32.mrf.mxu1 }
 0x11b   :  { %v319_v7 = vmul.f32 %v312_v5, %v1189_v3  ;;  %v1192_v8 = vadd.f32 %v932_v6, %v200_v60 }
 0x11c   :  { %v277_v9 = vpop.f32.mrf.mxu1 }
 0x11d   :  { %v1195_v12 = vadd.f32 %v277_v9, %v200_v60  ;;  %965 = vmatprep.mubr.f32.mxu0 %v319_v7  ;;  %v322_v14 = vmul.f32 %v316_v11, %v1192_v8 }
 0x11e   :  { %966 = vmatmul.mubr.f32.vlgmr.msra.gmra.mxu0 %v320_v10 }
 0x11f   :  { %v321_v13 = vmul.f32 %v316_v11, %v1195_v12 }
 0x121   :  { %968 = vmatprep.mubr.f32.mxu0 %v321_v13 }
 0x122   :  { %969 = vmatmul.mubr.f32.gmra.mxu0 %v322_v14 }
 0x123   :  { %1018 = vmatprep.mubr.msk.f32.mxu0 %vm1134_vm0, %v1133_v0 }
 0x1de   :  { %v967_v16 = vpop.f32.mrf.mxu0 }
 0x1df   :  { %v410_v18 = vsel %vm408_vm3, %v967_v16, -inf }
 0x1e0   :  { %v389_v17 = vpop.f32.mrf.mxu0 }
 0x1e1   :  { %v409_v19 = vsel %vm408_vm3, %v389_v17, -inf }
 0x1e2   :  { %v411_v20 = vmax.f32 %v409_v19, %v410_v18  ;;  %v970_v21 = vpop.f32.mrf.mxu0 }
 0x1e3   :  { %v419_v24 = vsel %vm408_vm3, %v970_v21, -inf }
 0x1e4   :  { %v412_v22 = vrot.slane %v411_v20, 4  ;;  %v399_v23 = vpop.f32.mrf.mxu0 }
 0x1e5   :  { %v418_v25 = vsel %vm408_vm3, %v399_v23, -inf }
 0x1e6   :  { %v413_v26 = vmax.f32 %v411_v20, %v412_v22  ;;  %v420_v27 = vmax.f32 %v418_v25, %v419_v24  ;;  %v112_v22 = vld [vmem:[#allocation7 + $0x1d0] sm:$0xff]  ;;  %v93_v24 = vld [vmem:[#allocation7 + $0x138] sm:$0xff] }
 0x1e7   :  { %v92_v25 = vld [vmem:[#allocation7 + $0x130] sm:$0xff]  ;;  %987 = vmatpush3.msra.mxu0 %v93_v24 }
 0x1e8   :  { %v414_v28 = vrot.slane %v413_v26, 2  ;;  %v421_v29 = vrot.slane %v420_v27, 4  ;;  %988 = vmatprep.subr.mxu0 %v1133_v0 }
 0x1e9   :  { %989 = vmatpush3.msra.mxu0 %v92_v25 }
 0x1ea   :  { %v415_v30 = vmax.f32 %v413_v26, %v414_v28  ;;  %v422_v31 = vmax.f32 %v420_v27, %v421_v29  ;;  %v91_v26 = vld [vmem:[#allocation7 + $0x128] sm:$0xff]  ;;  %990 = vmatprep.subr.mxu0 %v1133_v0  ;;  %v90_v27 = vld [vmem:[#allocation7 + $0x120] sm:$0xff]  ;;  %v89_v28 = vld [vmem:[#allocation7 + $0x118] sm:$0xff] }
 0x1eb   :  { %991 = vmatpush3.msra.mxu0 %v91_v26  ;;  %v88_v29 = vld [vmem:[#allocation7 + $0x110] sm:$0xff] }
 0x1ec   :  { %v416_v32 = vrot.slane %v415_v30, 1  ;;  %v423_v33 = vrot.slane %v422_v31, 2  ;;  %992 = vmatprep.subr.mxu0 %v1133_v0 }
 0x1ed   :  { %993 = vmatpush3.msra.mxu0 %v90_v27 }
 0x1ee   :  { %v417_v34 = vmax.f32 %v415_v30, %v416_v32  ;;  %v424_v35 = vmax.f32 %v422_v31, %v423_v33  ;;  %994 = vmatprep.subr.mxu0 %v1133_v0  ;;  %v87_v30 = vld [vmem:[#allocation7 + $0x108] sm:$0xff]  ;;  %v86_v31 = vld [vmem:[#allocation7 + $0x100] sm:$0xff]  ;;  %v85_v32 = vld [vmem:[#allocation7 + $0xf8] sm:$0xff] }
 0x1ef   :  { %995 = vmatpush3.msra.mxu0 %v89_v28  ;;  %v84_v33 = vld [vmem:[#allocation7 + $0xf0] sm:$0xff] }
 0x1f0   :  { %v427_v36 = vsub.f32 %v389_v17, %v417_v34  ;;  %v428_v37 = vsub.f32 %v967_v16, %v417_v34  ;;  %v425_v38 = vrot.slane %v424_v35, 1  ;;  %996 = vmatprep.subr.mxu0 %v1133_v0  ;;  %v83_v34 = vld [vmem:[#allocation7 + $0xe8] sm:$0xff] }
 0x1f1   :  { %997 = vmatpush3.msra.mxu0 %v88_v29 }
 0x1f2   :  { %v431_v39 = vmul.f32 1.442695, %v427_v36  ;;  %v433_v40 = vmul.f32 1.442695, %v428_v37  ;;  %v426_v41 = vmax.f32 %v424_v35, %v425_v38  ;;  %998 = vmatprep.subr.mxu0 %v1133_v0  ;;  %v82_v35 = vld [vmem:[#allocation7 + $0xe0] sm:$0xff]  ;;  %v81_v36 = vld [vmem:[#allocation7 + $0xd8] sm:$0xff] }
 0x1f3   :  { %999 = vmatpush3.msra.mxu0 %v87_v30  ;;  %v80_v37 = vld [vmem:[#allocation7 + $0xd0] sm:$0xff]  ;;  %v79_v38 = vld [vmem:[#allocation7 + $0xc8] sm:$0xff] }
 0x1f4   :  { %1030 = vpow2.f32 %v431_v39  ;;  %v429_v42 = vsub.f32 %v399_v23, %v426_v41  ;;  %v430_v43 = vsub.f32 %v970_v21, %v426_v41  ;;  %v111_v23 = vld [vmem:[#allocation7 + $0x1c8] sm:$0xff]  ;;  %1000 = vmatprep.subr.mxu0 %v1133_v0  ;;  %v78_v39 = vld [vmem:[#allocation7 + $0xc0] sm:$0xff] }
 0x1f5   :  { %1032 = vpow2.f32 %v433_v40  ;;  %1001 = vmatpush3.msra.mxu0 %v86_v31  ;;  %v603_v40 = vand.u32 127, %v115_v48 }
 0x1f6   :  { %v435_v44 = vmul.f32 1.442695, %v429_v42  ;;  %v437_v45 = vmul.f32 1.442695, %v430_v43  ;;  %1002 = vmatprep.subr.mxu0 %v1133_v0 }
 0x1f7   :  { %1003 = vmatpush3.msra.mxu0 %v85_v32  ;;  %v608_v42 = vadd.s32 4294967288, %v603_v40 }
 0x1f8   :  { %1034 = vpow2.f32 %v435_v44  ;;  %1004 = vmatprep.subr.mxu0 %v1133_v0 }
 0x1f9   :  { %1036 = vpow2.f32 %v437_v45  ;;  %1005 = vmatpush3.msra.mxu0 %v84_v33  ;;  %v611_v45 = vsub.s32 %v608_v42, %v1178_v49 }
 0x1fa   :  { %1006 = vmatprep.subr.mxu0 %v1133_v0 }
 0x1fb   :  { %1007 = vmatpush3.msra.mxu0 %v83_v34 }
 0x1fc   :  { %1008 = vmatprep.subr.mxu0 %v1133_v0 }
 0x1fd   :  { %1009 = vmatpush3.msra.mxu0 %v82_v35 }
 0x1fe   :  { %1010 = vmatprep.subr.mxu0 %v1133_v0 }
 0x1ff   :  { %1011 = vmatpush3.msra.mxu0 %v81_v36 }
 0x200   :  { %1012 = vmatprep.subr.mxu0 %v1133_v0 }
 0x201   :  { %v1031_v46 = vpop.eup %1030  ;;  %1013 = vmatpush3.msra.mxu0 %v80_v37 }
 0x202   :  { %v1033_v47 = vpop.eup %1032  ;;  %v439_v50 = vsel %vm408_vm3, %v1031_v46, 0.0  ;;  %1014 = vmatprep.subr.mxu0 %v1133_v0 }
 0x203   :  { %v440_v51 = vsel %vm408_vm3, %v1033_v47, 0.0  ;;  %1015 = vmatpush3.msra.mxu0 %v79_v38 }
 0x204   :  { %v441_v52 = vadd.f32 %v440_v51, %v439_v50  ;;  %1016 = vmatprep.subr.mxu0 %v1133_v0 }
 0x205   :  { %v1035_v54 = vpop.eup %1034  ;;  %1017 = vmatpush3.msra.mxu0 %v78_v39 }
 0x206   :  { %v1037_v55 = vpop.eup %1036  ;;  %v442_v56 = vrot.slane %v441_v52, 4  ;;  %v448_v57 = vsel %vm408_vm3, %v1035_v54, 0.0 }
 0x207   :  { %v449_v58 = vsel %vm408_vm3, %v1037_v55, 0.0 }
 0x208   :  { %v443_v59 = vadd.f32 %v442_v56, %v441_v52  ;;  %v450_v60 = vadd.f32 %v449_v58, %v448_v57 }
 0x20a   :  { %v444_v61 = vrot.slane %v443_v59, 2  ;;  %v451_v62 = vrot.slane %v450_v60, 4 }
 0x20c   :  { %v445_v63 = vadd.f32 %v444_v61, %v443_v59  ;;  %v452_v2 = vadd.f32 %v451_v62, %v450_v60 }
 0x20e   :  { %v446_v4 = vrot.slane %v445_v63, 1  ;;  %v453_v5 = vrot.slane %v452_v2, 2 }
 0x210   :  { %v454_v6 = vadd.f32 %v453_v5, %v452_v2  ;;  %v447_v7 = vadd.f32 %v446_v4, %v445_v63 }
 0x212   :  { %v455_v9 = vrot.slane %v454_v6, 1  ;;  %1038 = vrcp.f32 %v447_v7 }
 0x214   :  { %v456_v10 = vadd.f32 %v455_v9, %v454_v6 }
 0x216   :  { %1040 = vrcp.f32 %v456_v10 }
 0x21f   :  { %v1039_v11 = vpop.eup %1038 }
 0x220   :  { %v459_v13 = vmul.f32 %v1039_v11, %v1031_v46  ;;  %v460_v14 = vmul.f32 %v1039_v11, %v1033_v47  ;;  %v606_v47 = vsub.s32 %v603_v40, %v1178_v49 }
 0x222   :  { %973 = vmatprep.mubr.msk.f32.mxu1 %vm408_vm3, %v459_v13  ;;  %v582_v15 = vsel %vm408_vm3, %v459_v13, 0.0  ;;  %v585_v19 = vsel %vm408_vm3, %v460_v14, 0.0 }
 0x223   :  { %v1041_v16 = vpop.eup %1040  ;;  %583 = vadd.xlane.f32.xlu0 %v582_v15  ;;  %974 = vmatmul.mubr.msk.f32.vlgmr.msra.gmra.mxu1 %vm408_vm3, %v460_v14 }
 0x224   :  { %v461_v17 = vmul.f32 %v1041_v16, %v1035_v54  ;;  %v462_v18 = vmul.f32 %v1041_v16, %v1037_v55  ;;  %980 = vmatpush3.msra.mxu1 %v112_v22 }
 0x225   :  { %981 = vmatprep.subr.mxu1 %v1133_v0 }
 0x226   :  { %976 = vmatprep.mubr.msk.f32.mxu1 %vm408_vm3, %v461_v17  ;;  %v588_v20 = vsel %vm408_vm3, %v461_v17, 0.0  ;;  %v591_v21 = vsel %vm408_vm3, %v462_v18, 0.0  ;;  %982 = vmatpush3.msra.mxu1 %v111_v23 }
 0x227   :  { %586 = vadd.xlane.f32.xlu0 %v585_v19  ;;  %589 = vadd.xlane.f32.xlu1 %v588_v20 }
 0x228   :  { %977 = vmatmul.mubr.msk.f32.gmra.mxu1 %vm408_vm3, %v462_v18 }
 0x229   :  { %983 = vmatprep.mubr.msk.f32.mxu1 %vm1134_vm0, %v1133_v0 }
 0x22b   :  { %592 = vadd.xlane.f32.xlu1 %v591_v21 }
 0x2ac   :  { %v584_v41 = vpop.xlane.xlu0 %583 }
 0x2ad   :  { %v594_v50 = vmul.f32 0.25, %v584_v41 }
 0x2af   :  { %v607_v56 = vrot.slane %v594_v50, %v606_v47 }
 0x2b0   :  { %v587_v43 = vpop.xlane.xlu0 %586  ;;  %v590_v44 = vpop.xlane.xlu1 %589 }
 0x2b1   :  { %v595_v46 = vmul.f32 0.25, %v587_v43  ;;  %v596_v51 = vmul.f32 0.25, %v590_v44 }
 0x2b3   :  { %v612_v54 = vrot.slane %v595_v46, %v611_v45  ;;  %v618_v0 = vrot.slane %v596_v51, %v606_v47 }
 0x2b4   :  { %v593_v52 = vpop.xlane.xlu1 %592 }
 0x2b5   :  { %v597_v55 = vmul.f32 0.25, %v593_v52  ;;  %v614_v48 = vsel %vm613_vm4, %v612_v54, %v607_v56 }
 0x2b7   :  { %v622_v57 = vrot.slane %v597_v55, %v611_v45 }
 0x2b9   :  { %v623_v58 = vsel %vm613_vm4, %v622_v57, %v618_v0 }
 0x2ba   :  { %v625_v59 = vsel %vm624_vm5, %v623_v58, %v614_v48 }
 0x2bb   :  { %984 = vmatmul.mubr.msk.f32.vlgmr.msra.gmra.mxu1 %vm626_vm6, %v625_v59 }
 0x2e3   :  { %v975_v60 = vpop.f32.mrf.mxu1 }
 0x2e4   :  { %v565_v62 = vmul.f32 %v975_v60, %v1187_v1 }
 0x2e5   :  { %v545_v61 = vpop.f32.mrf.mxu1 }
 0x2e6   :  { %v564_v63 = vmul.f32 %v545_v61, %v1189_v3 }
 0x2e8   :  { %v568_v2 = vadd.f32 %v565_v62, %v564_v63  ;;  %v978_v4 = vpop.f32.mrf.mxu1 }
 0x2e9   :  { %v567_v7 = vmul.f32 %v978_v4, %v1192_v8  ;;  %v701_v8 = vsub.s32 2, %v1178_v49 }
 0x2ea   :  { %v569_v5 = vrot.slane %v568_v2, 4  ;;  %v555_v6 = vpop.f32.mrf.mxu1 }
 0x2eb   :  { %v566_v9 = vmul.f32 %v555_v6, %v1195_v12  ;;  %v702_v12 = vrot.slane %v1181_v53, %v701_v8 }
 0x2ec   :  { %v570_v10 = vadd.f32 %v569_v5, %v568_v2 }
 0x2ed   :  { %v575_v11 = vadd.f32 %v567_v7, %v566_v9 }
 0x2ee   :  { %v571_v13 = vrot.slane %v570_v10, 2 }
 0x2ef   :  { %v576_v14 = vrot.slane %v575_v11, 4 }
 0x2f0   :  { %v572_v15 = vadd.f32 %v571_v13, %v570_v10 }
 0x2f1   :  { %v577_v16 = vadd.f32 %v576_v14, %v575_v11 }
 0x2f2   :  { %v573_v18 = vrot.slane %v572_v15, 1 }
 0x2f3   :  { %v578_v17 = vrot.slane %v577_v16, 2 }
 0x2f4   :  { %v574_v20 = vadd.f32 %v573_v18, %v572_v15 }
 0x2f5   :  { %v579_v19 = vadd.f32 %v578_v17, %v577_v16 }
 0x2f7   :  { %v580_v1 = vrot.slane %v579_v19, 1 }
 0x2f9   :  { %v581_v3 = vadd.f32 %v580_v1, %v579_v19 }
 0x2fb   :  { %v705_v21 = vsel %vm624_vm5, %v581_v3, %v574_v20 }
 0x2fc   :  { %1019 = vmatmul.mubr.f32.vlgmr.msra.gmra.mxu0 %v705_v21 }
 0x37b   :  { %v695_v22 = vpop.f32.mrf.mxu1 }
 0x37d   :  { %v985_v23 = vpop.f32.mrf.mxu1 }
 0x3bc   :  { %v773_v24 = vpop.f32.mrf.mxu0 }
 0x3bd   :  { %v774_v25 = vadd.f32 %v773_v24, %v702_v12 }
 0x3be   :  { %v1020_v26 = vpop.f32.mrf.mxu0 }
 0x3bf   :  { %v777_v27 = vadd.f32 %v774_v25, %v695_v22 }
 0x3c1   :  { %778 = vst [vmem:[#allocation8] sm:$0x3] %v777_v27 }
 0x3c2   :  { %1113 = shalt.err (!%p1110_p5)
}
 0x3c3   :  { %788 = dma.vmem_to_hbm [thread:$0]  %s786_s2, 32, %s1253_s3, [#allocation4]  }
 0x3c4   :  { %1126 = dma.done.wait [#allocation4], 32  }
 0x3c5   :  { %1127 = vsyncadd [#allocation4], 4294967264 }
 0x3c6   :  { %792 = vsyncpa [#allocation3], 1 }
 0x3c7   :  { %793 = vsyncpa [#allocation6], 1 }
 0x3c8   :  { %794 = vsyncpa [#allocation4], 1 }

</bundles_post_ra>
